<compile_context>
chip_gen: v5e
topology: v5e:2x2
jax: 0.10.0
libtpu: 0.0.40
codegen_flags: <defaults>
</compile_context>

<pallas_src>
import jax
import jax.numpy as jnp
from jax.experimental import pallas as pl
from jax.experimental.pallas import tpu as pltpu

_LANES = 128
_MAX_BLOCK_ROWS = 1024  # 1024 * 128 * 4 B = 512 KiB f32 per grid block


def _round_up(x: int, m: int) -> int:
    return ((x + m - 1) // m) * m


def _least_d_loss_kernel(w_ref, x_ref, out_ref, acc_ref):
    """Accumulates sum_i w_i * (1 - x_i)^2 over the grid; final reduce at end."""
    i = pl.program_id(0)

    @pl.when(i == 0)
    def _():
        acc_ref[...] = jnp.zeros_like(acc_ref)

    x = x_ref[...].astype(jnp.float32)
    d = jnp.float32(1.0) - x
    acc_ref[...] += (d * d) * w_ref[i]          # w_ref[i]: per-block 1/numel

    @pl.when(i == pl.num_programs(0) - 1)
    def _():
        out_ref[0, 0] = jnp.sum(acc_ref[...])


def least_d_loss(disc_outputs):
    """Pallas implementation of LeastDLoss.forward: sum_i mean((1 - dg_i)^2)."""
    if not isinstance(disc_outputs, (list, tuple)):
        disc_outputs = [disc_outputs]
    disc_outputs = list(disc_outputs)

    sizes = [int(x.size) for x in disc_outputs]

    # Common storage dtype for the fused slab (kernel accumulates in f32; no
    # forced up-cast if all inputs already share a dtype, e.g. bf16).
    dtypes = {x.dtype for x in disc_outputs}
    slab_dtype = disc_outputs[0].dtype if len(dtypes) == 1 else jnp.float32

    # Adaptive block size: big tensors get ~512 KiB blocks, tiny ones (8,128).
    max_rows = max(pl.cdiv(n, _LANES) for n in sizes)
    block_rows = min(_MAX_BLOCK_ROWS, _round_up(max_rows, 8))
    block_elems = block_rows * _LANES

    slabs = []
    weights = []
    for x, n in zip(disc_outputs, sizes):
        n_blocks = pl.cdiv(n, block_elems)
        padded = n_blocks * block_elems
        flat = jnp.ravel(x).astype(slab_dtype)
        # Pad with the target value 1 -> padding contributes exactly 0.
        flat = jnp.pad(flat, (0, padded - n), constant_values=1.0)
        slabs.append(flat.reshape(padded // _LANES, _LANES))
        weights.extend([1.0 / n] * n_blocks)

    slab = jnp.concatenate(slabs, axis=0) if len(slabs) > 1 else slabs[0]
    w = jnp.asarray(weights, dtype=jnp.float32)
    num_blocks = len(weights)

    out = pl.pallas_call(
        _least_d_loss_kernel,
        out_shape=jax.ShapeDtypeStruct((1, 1), jnp.float32),
        grid_spec=pltpu.PrefetchScalarGridSpec(
            num_scalar_prefetch=0,
            grid=(num_blocks,),
            in_specs=[
                pl.BlockSpec(memory_space=pltpu.SMEM),             # per-block weights
                pl.BlockSpec((block_rows, _LANES), lambda i: (i, 0)),
            ],
            out_specs=pl.BlockSpec(
                (1, 1), lambda i: (0, 0), memory_space=pltpu.SMEM
            ),
            scratch_shapes=[pltpu.VMEM((block_rows, _LANES), jnp.float32)],
        ),
        compiler_params=pltpu.CompilerParams(
            dimension_semantics=("arbitrary",),
        ),
    )(w, slab)
    return out[0, 0]


def _reference(disc_outputs):
    """Pure-JAX reference for correctness check."""
    if not isinstance(disc_outputs, (list, tuple)):
        disc_outputs = [disc_outputs]
    total = jnp.float32(0.0)
    for dg in disc_outputs:
        dg = dg.astype(jnp.float32)
        total = total + jnp.mean((1.0 - dg) ** 2)
    return total


if __name__ == "__main__":
    key = jax.random.PRNGKey(0)
    # Multi-scale discriminator outputs: a list of score tensors (B, C, T).
    shapes = [(2, 1, 64), (2, 4, 16), (2, 1, 37)]
    keys = jax.random.split(key, len(shapes))
    disc_outputs = [
        jax.random.normal(k, s, dtype=jnp.float32)
        for k, s in zip(keys, shapes)
    ]

    loss = least_d_loss(disc_outputs)
    loss = jax.block_until_ready(loss)

    ref = _reference(disc_outputs)
    assert jnp.allclose(loss, ref, rtol=1e-5, atol=1e-5), (loss, ref)

    print("KERNEL_OK")
</pallas_src>

<mosaic_0001>
module attributes {stable_mosaic.version = 11 : i64} {
  func.func @_least_d_loss_kernel(%arg0: i32, %arg1: memref<3xf32, #tpu.memory_space<smem>>, %arg2: memref<8x128xf32, #tpu.memory_space<vmem>>, %arg3: memref<1x1xf32, #tpu.memory_space<smem>>, %arg4: memref<8x128xf32, #tpu.memory_space<vmem>>) attributes {dimension_semantics = [#tpu.dimension_semantics<arbitrary>], iteration_bounds = array<i64: 3>, scalar_prefetch = 0 : i64, scratch_operands = 1 : i64, tpu.core_type = #tpu.core_type<tc>, window_params = [{transform_indices = @transform_0, window_bounds = array<i64: 3>}, {transform_indices = @transform_1, window_bounds = array<i64: 8, 128>}, {transform_indices = @transform_2, window_bounds = array<i64: 1, 1>}]} {
    %c0_i32 = arith.constant 0 : i32
    %0 = arith.cmpi eq, %arg0, %c0_i32 : i32
    %1 = arith.extui %0 : i1 to i32
    %c0_i32_0 = arith.constant 0 : i32
    %2 = arith.cmpi ne, %1, %c0_i32_0 : i32
    scf.if %2 {
      %cst_7 = arith.constant 0.000000e+00 : f32
      %17 = vector.broadcast %cst_7 : f32 to vector<8x128xf32>
      %c0_8 = arith.constant 0 : index
      %c0_9 = arith.constant 0 : index
      %18 = vector.load %arg4[%c0_8, %c0_9] : memref<8x128xf32, #tpu.memory_space<vmem>>, vector<8x128xf32>
      tpu.vector_store %arg4[%c0_8, %c0_9], %17 {strides = array<i32>} : memref<8x128xf32, #tpu.memory_space<vmem>>, vector<8x128xf32>,
    } else {
    }
    %c0 = arith.constant 0 : index
    %c0_1 = arith.constant 0 : index
    %3 = vector.load %arg2[%c0, %c0_1] : memref<8x128xf32, #tpu.memory_space<vmem>>, vector<8x128xf32>
    %cst = arith.constant 1.000000e+00 : f32
    %4 = vector.broadcast %cst : f32 to vector<8x128xf32>
    %5 = arith.subf %4, %3 : vector<8x128xf32>
    %c0_2 = arith.constant 0 : index
    %c0_3 = arith.constant 0 : index
    %6 = vector.load %arg4[%c0_2, %c0_3] : memref<8x128xf32, #tpu.memory_space<vmem>>, vector<8x128xf32>
    %7 = arith.mulf %5, %5 : vector<8x128xf32>
    %8 = arith.index_cast %arg0 : i32 to index
    %9 = memref.load %arg1[%8] : memref<3xf32, #tpu.memory_space<smem>>
    %10 = vector.broadcast %9 : f32 to vector<8x128xf32>
    %11 = arith.mulf %7, %10 : vector<8x128xf32>
    %12 = arith.addf %6, %11 : vector<8x128xf32>
    %c0_4 = arith.constant 0 : index
    %c0_5 = arith.constant 0 : index
    %13 = vector.load %arg4[%c0_4, %c0_5] : memref<8x128xf32, #tpu.memory_space<vmem>>, vector<8x128xf32>
    tpu.vector_store %arg4[%c0_4, %c0_5], %12 {strides = array<i32>} : memref<8x128xf32, #tpu.memory_space<vmem>>, vector<8x128xf32>,
    %c2_i32 = arith.constant 2 : i32
    %14 = arith.cmpi eq, %arg0, %c2_i32 : i32
    %15 = arith.extui %14 : i1 to i32
    %c0_i32_6 = arith.constant 0 : i32
    %16 = arith.cmpi ne, %15, %c0_i32_6 : i32
    scf.if %16 {
      %c0_7 = arith.constant 0 : index
      %c0_8 = arith.constant 0 : index
      %17 = vector.load %arg4[%c0_7, %c0_8] : memref<8x128xf32, #tpu.memory_space<vmem>>, vector<8x128xf32>
      %18 = vector.shape_cast %17 : vector<8x128xf32> to vector<1x8x128xf32>
      %cst_9 = arith.constant dense<0.000000e+00> : vector<1xf32>
      %19 = vector.multi_reduction <add>, %18, %cst_9 [1, 2] : vector<1x8x128xf32> to vector<1xf32>
      %20 = vector.shape_cast %19 : vector<1xf32> to vector<1x1x1xf32>
      %21 = vector.extract %20[0, 0, 0] : f32 from vector<1x1x1xf32>
      %c0_10 = arith.constant 0 : index
      %c0_11 = arith.constant 0 : index
      %22 = memref.load %arg3[%c0_10, %c0_11] : memref<1x1xf32, #tpu.memory_space<smem>>
      memref.store %21, %arg3[%c0_10, %c0_11] : memref<1x1xf32, #tpu.memory_space<smem>>
    } else {
    }
    return
  }
  func.func @transform_0(%arg0: i32) -> i32 {
    %c0_i32 = arith.constant 0 : i32
    %c0_i32_0 = arith.constant 0 : i32
    return %c0_i32 : i32
  }
  func.func @transform_1(%arg0: i32) -> (i32, i32) {
    %c0_i32 = arith.constant 0 : i32
    %c0_i32_0 = arith.constant 0 : i32
    return %arg0, %c0_i32 : i32, i32
  }
  func.func @transform_2(%arg0: i32) -> (i32, i32) {
    %c0_i32 = arith.constant 0 : i32
    %c0_i32_0 = arith.constant 0 : i32
    %c0_i32_1 = arith.constant 0 : i32
    return %c0_i32, %c0_i32_0 : i32, i32
  }
}

</mosaic_0001>

<bundles_post_ra>
// kernel: tpu_custom_call.1
= control target key start
LH: loop header
LB: loop body
LE: loop exit
PB: predicated region body
PF: predicated region fallthrough
CT: control target
= control target key end

     0   :  { %7 = vsyncpa [#allocation5], 0  ;;  %s566_s0 = inlined_call_operand.hbm [shape: f32[3], index: 0, kind: input, shape index: {}]   ;;  %s567_s1 = inlined_call_operand.hbm [shape: f32[24,128], index: 1, kind: input, shape index: {}]   ;;  %s568_s2 = inlined_call_operand.hbm [shape: f32[1,1], index: 2, kind: output, shape index: {}]  }
   0x1   :  { %8 = vsyncpa [#allocation4], 0 }
   0x2   :  { %10 = vsyncpa [#allocation4 + $0x1], 0 }
   0x3   :  { %11 = vsyncpa [#allocation6], 0  ;;  %s459_s9 = smov 0   ;;  %s461_s10 = smov 0  }
   0x4   :  { %s463_s11 = smov 0   ;;  %s465_s12 = smov 0  }
   0x5 LB: > { %s478_s13 = sadd.s32 4294967295, %s439_s12   ;;  %p58_p0 = scmp.ne.s32.totalorder %s431_s10, %s427_s9  ;;  %s439_s12 = sphi %s465_s12, %s575_s12   ;;  %s435_s11 = sphi %s463_s11, %s574_s11   ;;  %s431_s10 = sphi %s461_s10, %s573_s10   ;;  %s427_s9 = sphi %s459_s9, %s572_s9  }
   0x6   : > { %p59_p1 = scmp.eq.s32.totalorder %s478_s13, 0  ;;  %p264_p2 = scmp.ge.s32.totalorder %s439_s12, 1 }
   0x7   : > { %p90_p3 = scmp.lt.s32.totalorder %s439_s12, 4  ;;  %p265_p4 = scmp.ne.s32.totalorder %s478_s13, 0 }
   0x8   : > { %p487_p5 = por %p59_p1, %p58_p0  ;;  %s102_s17 = sshll.u32 %s566_s0, 4  ;;  %s103_s17 = int_to_ptr.hbm [resolvable:$true] %s102_s17 }
   0x9   : > { %p494_p6 = pnand %p264_p2, %p90_p3  ;;  %s501_s19 = sadd.s32 1, %s439_s12  }
   0xa   : > { %s42_s20 = ssub.s32 %s439_s12, %s501_s19  ;;  %s45_s21 = sadd.s32 1, %s435_s11 }
   0xb   : > { %p290_p7 = pneg %p494_p6  ;;  %p43_p9 = scmp.eq.s32.totalorder %s42_s20, 0 }
   0xc   : > { %p52_p10 = scmp.ne.s32.totalorder %s435_s11, %s431_s10  ;;  %s441_s22 = smov [#allocation3]  }
   0xd   : > { %p291_p8 = pnand %p290_p7, %p59_p1  ;;  %p53_p11 = scmp.eq.s32.totalorder %s439_s12, 0 }
   0xe   : > { %s511_s23 = scalar_select %p43_p9, %s435_s11, %s45_s21  }
   0xf   : > { %293 = dma.hbm_to_smem (!%p291_p8), %s103_s17, 16, %s441_s22, [#allocation5]  }
  0x10   : > { %p299_p12 = scmp.lt.s32.totalorder %s439_s12, 3  ;;  %s113_s24 = sand.u32 1, %s435_s11  }
  0x11   : > { %s268_s25 = sshll.u32 %s439_s12, 3  ;;  %p54_p13 = por %p53_p11, %p52_p10 }
  0x12   : > { %s267_s26 = sshll.u32 %s113_s24, 3  ;;  %s121_s29 = scalar_lea.hbm %s567_s1, %s268_s25 }
  0x13   : > { %s123_s30 = sshll.u32 %s121_s29, 4  ;;  %s117_s3 = scalar_lea.vmem [#allocation7], %s267_s26  ;;  %s124_s30 = int_to_ptr.hbm [resolvable:$true] %s123_s30 }
  0x14   : > { %s125_s4 = sshll.u32 %s117_s3, 4  ;;  %p520_p0 = pnand %p299_p12, %p54_p13  ;;  %s126_s4 = int_to_ptr.vmem [resolvable:$true] %s125_s4 }
  0x15   : > { %s114_s6 = scalar_lea.sflag [#allocation4], %s113_s24  ;;  %s353_s7 = sshra.s32 %s124_s30, 4  ;;  %s354_s7 = int_to_ptr.hbm [resolvable:$true] %s353_s7 }
  0x16   : > { %s355_s8 = scalar_lea.hbm %s354_s7, 8  ;;  %p357_p3 = pneg %p520_p0 }
  0x17   : > { %p356_p2 = scmp.ne.s32.totalorder %s354_s7, %s355_s8  ;;  %s360_s15 = scalar_lea.hbm %s567_s1, 24 }
  0x18   : > { %p361_p9 = scmp.lt.s32.totalorder %s354_s7, %s567_s1  ;;  %p362_p10 = scmp.lt.s32.totalorder %s360_s15, %s355_s8 }
  0x19   : > { %p358_p7 = pnand %p357_p3, %p356_p2 }
  0x1a   : > { %p363_p11 = por %p362_p10, %p361_p9 }
  0x1b   : > { %p359_p8 = pneg %p358_p7 }
  0x1d   : > { %p364_p12 = pnand %p363_p11, %p359_p8 }
  0x1f   : > { %367 = shalt.err (!%p364_p12)
}
  0x20   : > { %297 = dma.hbm_to_vmem [thread:$0]  (!%p520_p0), %s124_s30, 128, %s126_s4, %s114_s6  }
  0x21   : > { %134 = sbr.rel (%p494_p6) target bundleno = 256 (0x100), region = 28 }
  0x26   : > { %414 = dma.done.wait (%p59_p1), [#allocation5], 16  }
  0x27   : > { %416 = vsyncadd (%p59_p1), [#allocation5], 4294967280  ;;  %s141_s20 = sand.u32 1, %s431_s10  }
  0x28   : > { %s271_s21 = sshll.u32 %s141_s20, 3  ;;  %s142_s22 = scalar_lea.sflag [#allocation4], %s141_s20 }
  0x29   : > { %s145_s24 = scalar_lea.vmem [#allocation7], %s271_s21 }
  0x2a   : > { %418 = dma.done.wait (%p487_p5), %s142_s22, 128  }
  0x2b   : > { %420 = vsyncadd (%p487_p5), %s142_s22, 4294967168 }
  0x2c   : > { %151 = sfence }
  0x2d   : > { %166 = sbr.rel (%p265_p4) target bundleno = 52 (0x34), region = 40 }
  0x32   : > { %v442_v0 = vmov 0.0  }
  0x33   : > { %167 = vst [vmem:[#allocation2] sm:$0xff] %v442_v0 }
  0x34 PF: > { %v168_v1 = vld [vmem:[%s145_s24] sm:$0xff]  ;;  %s172_s18 = sld [smem:[#allocation3 + %s478_s13]]  ;;  %p273_p1 = scmp.ne.s32.totalorder %s478_s13, 2 }
  0x35   : > { %v169_v2 = vsub.f32 1.0, %v168_v1 }
  0x37   : > { %v171_v3 = vmul.f32 %v169_v2, %v169_v2 }
  0x3a   : > { %v170_v4 = vld [vmem:[#allocation2] sm:$0xff]  ;;  %v173_v5 = vstv %s172_s18 }
  0x3b   : > { %v174_v6 = vmul.f32 %v173_v5, %v171_v3  ;;  %180 = sbr.rel (%p273_p1) target bundleno = 250 (0xfa), region = 44 }
  0x3d   : > { %v175_v7 = vadd.f32 %v174_v6, %v170_v4 }
  0x3f   : > { %176 = vst [vmem:[#allocation2] sm:$0xff] %v175_v7 }
  0x46   : > { %v181_v8 = vld [vmem:[#allocation2] sm:$0xff] }
  0x47   : > { %182 = vadd.xlane.f32.xlu0 %v181_v8 }
  0xba   : > { %v183_v9 = vpop.xlane.xlu0 %182 }
  0xbb   : > { %v184_v10 = vrot.slane %v183_v9, 4 }
  0xbd   : > { %v185_v11 = vadd.f32 %v184_v10, %v183_v9 }
  0xbf   : > { %v186_v12 = vrot.slane %v185_v11, 2 }
  0xc1   : > { %v187_v13 = vadd.f32 %v186_v12, %v185_v11 }
  0xc3   : > { %v188_v14 = vrot.slane %v187_v13, 1 }
  0xc5   : > { %v189_v15 = vadd.f32 %v188_v14, %v187_v13 }
  0xc7   : > { %278 = vpush %v189_v15 }
  0xf8   : > { %s279_s14 = spop %278 }
  0xf9   : > { %192 = sst [smem:[#allocation8]] %s279_s14 }
  0xfa PF: > { %p301_p4 = scmp.eq.s32.totalorder %s478_s13, 2  ;;  %s199_s27 = sshll.u32 %s568_s2, 4  ;;  %s200_s27 = int_to_ptr.hbm [resolvable:$true] %s199_s27 }
  0xfb   : > { %s443_s28 = smov [#allocation8]  }
  0xfc   : > { %287 = dma.smem_to_hbm (%p301_p4), %s443_s28, 16, %s200_s27, [#allocation6]  }
  0xfd   : > { %422 = dma.done.wait (%p301_p4), [#allocation6], 16  }
  0xfe   : > { %424 = vsyncadd (%p301_p4), [#allocation6], 4294967280 }
  0xff   : > { %208 = sfence }
 0x100 PF: > { %p14_p5 = scmp.ge.s32.totalorder %s501_s19, 5   ;;  %s572_s9 = smov %s431_s10 }
 0x101   : > { %s573_s10 = smov %s435_s11  ;;  %s574_s11 = smov %s511_s23 }
 0x102   : > { %s575_s12 = smov %s501_s19  ;;  %16 = sbr.rel (!%p14_p5) target bundleno = 5 (0x5), region = 79 }
 0x107   :  { %214 = vsyncpa [#allocation4], 1 }
 0x108   :  { %216 = vsyncpa [#allocation4 + $0x1], 1 }
 0x109   :  { %217 = vsyncpa [#allocation5], 1 }
 0x10a   :  { %219 = vsyncpa [#allocation5 + $0x1], 1 }
 0x10b   :  { %220 = vsyncpa [#allocation6], 1 }
 0x10c   :  { %222 = vsyncpa [#allocation6 + $0x1], 1 }

</bundles_post_ra>
